<compile_context>
chip_gen: v7x
topology: tpu7x:2x2x1
jax: 0.10.0
libtpu: 0.0.40
codegen_flags: <defaults>
</compile_context>

<pallas_src>
import functools

import jax
import jax.numpy as jnp
from jax.experimental import pallas as pl
from jax.experimental.pallas import tpu as pltpu


def _focal_bce_kernel(x_ref, t_ref, o_ref, *, focus_param, balance_param,
                      use_focal_weights, assume_binary_targets):
    x = x_ref[...].astype(jnp.float32)
    t = t_ref[...].astype(jnp.float32)

    # Numerically stable BCE-with-logits (matches torch BCEWithLogitsLoss,
    # reduction='none').
    e = jnp.exp(-jnp.abs(x))                    # EUP exp (reused below)
    bce = jnp.maximum(x, 0.0) - x * t + jnp.log1p(e)

    if not use_focal_weights:
        o_ref[...] = bce.astype(o_ref.dtype)
        return

    logpt = -bce
    if assume_binary_targets:
        # pt for hard 0/1 targets, reusing e = exp(-|x|):
        #   sigma(x) = 1/(1+e)   if x >= 0
        #            = e/(1+e)   if x <  0
        #   pt = sigma(x) if t == 1 else 1 - sigma(x)
        # Saves one EUP exp per element (approx vrcp + VPU selects instead).
        inv = pl.reciprocal(1.0 + e, approx=True)
        sigma = jnp.where(x >= 0.0, inv, e * inv)
        pt = jnp.where(t >= 0.5, sigma, 1.0 - sigma)
    else:
        pt = jnp.exp(logpt)                     # exact; valid for soft targets

    one_minus_pt = 1.0 - pt

    fp = float(focus_param)
    if fp.is_integer() and 0.0 <= fp <= 8.0:
        # Integer power -> repeated VPU multiplies (no pow -> exp/log on EUP).
        p = int(fp)
        if p == 0:
            w = jnp.ones_like(one_minus_pt)
        else:
            w = one_minus_pt
            for _ in range(p - 1):
                w = w * one_minus_pt
    else:
        w = one_minus_pt ** fp

    out = balance_param * (-(w * logpt))
    o_ref[...] = out.astype(o_ref.dtype)


def multiclass_bce_loss(outputs, targets, *, use_focal_weights=True,
                        focus_param=2, balance_param=0.25,
                        assume_binary_targets=False,
                        lane_width=512,
                        target_tile_bytes=2 * 1024 * 1024):
    """Elementwise focal-weighted BCE-with-logits loss (reduction='none').

    outputs.shape == targets.shape, arbitrary rank >= 2.  Returns the same
    shape/dtype as `outputs`.
    """
    assert outputs.shape == targets.shape
    assert outputs.ndim >= 2            # module asserts matching batch/class dims
    assert lane_width % 128 == 0

    orig_shape = outputs.shape
    out_dtype = outputs.dtype
    total = int(outputs.size)
    last = int(orig_shape[-1])

    # ---- choose a lane-dense 2-D layout (zero-copy whenever possible) ------
    if last % 128 == 0:
        # Fast path A: last dim is already lane-aligned; just collapse leading
        # dims.  No pad, no output slice.
        lane = last
        rows = total // lane
        x2 = outputs.reshape(rows, lane)
        t2 = targets.reshape(rows, lane)
        needs_slice = False
    elif total % lane_width == 0:
        # Fast path B: flatten + reshape only (no pad, no output slice).
        lane = lane_width
        rows = total // lane
        x2 = outputs.reshape(rows, lane)
        t2 = targets.reshape(rows, lane)
        needs_slice = False
    else:
        # General path: pad just the final partial row (< lane_width elems).
        lane = lane_width
        rows = int(pl.cdiv(total, lane))
        pad = rows * lane - total
        x2 = jnp.pad(outputs.reshape(-1), (0, pad)).reshape(rows, lane)
        t2 = jnp.pad(targets.reshape(-1), (0, pad)).reshape(rows, lane)
        needs_slice = True

    # ---- tile sizing --------------------------------------------------------
    in_itemsize = jnp.dtype(outputs.dtype).itemsize
    if rows <= 8:
        # Block equals the full (small) row extent: no (8,128) divisibility
        # requirement, single grid step.
        block_rows = rows
    else:
        # ~target_tile_bytes per operand tile, multiple of 8 sublanes.
        br = max(8, (target_tile_bytes // (lane * in_itemsize)) // 8 * 8)
        # Guarantee >= 2 grid steps so both v7x TensorCores get work.
        half = int(pl.cdiv(int(pl.cdiv(rows, 2)), 8)) * 8
        block_rows = int(min(br, half))
    grid = (int(pl.cdiv(rows, block_rows)),)

    kernel = functools.partial(
        _focal_bce_kernel,
        focus_param=float(focus_param),
        balance_param=float(balance_param),
        use_focal_weights=use_focal_weights,
        assume_binary_targets=assume_binary_targets,
    )

    spec = pl.BlockSpec((block_rows, lane), lambda i: (i, 0))

    n = rows * lane
    cost = pl.CostEstimate(
        flops=12 * n,
        transcendentals=3 * n,
        bytes_accessed=n * (2 * in_itemsize + jnp.dtype(out_dtype).itemsize),
    )

    out2 = pl.pallas_call(
        kernel,
        out_shape=jax.ShapeDtypeStruct((rows, lane), out_dtype),
        grid=grid,
        in_specs=[spec, spec],
        out_specs=spec,
        compiler_params=pltpu.CompilerParams(
            dimension_semantics=("parallel",),
            vmem_limit_bytes=32 * 1024 * 1024),
        cost_estimate=cost,
    )(x2, t2)

    if needs_slice:
        return out2.reshape(-1)[:total].reshape(orig_shape)
    return out2.reshape(orig_shape)


def _reference(outputs, targets, use_focal_weights=True,
               focus_param=2, balance_param=0.25):
    x = outputs.astype(jnp.float32)
    t = targets.astype(jnp.float32)
    bce = jnp.maximum(x, 0.0) - x * t + jnp.log1p(jnp.exp(-jnp.abs(x)))
    if not use_focal_weights:
        return bce.astype(outputs.dtype)
    logpt = -bce
    pt = jnp.exp(logpt)
    focal = -((1.0 - pt) ** focus_param) * logpt
    return (balance_param * focal).astype(outputs.dtype)


if __name__ == "__main__":
    key = jax.random.PRNGKey(0)
    k1, k2, k3, k4, k5, k6 = jax.random.split(key, 6)

    # --- Test 1: (16, 80) -- last dim not lane aligned, total not a multiple
    # of lane_width -> exercises the pad-last-row + output-slice path.
    N, C = 16, 80
    out1 = jax.random.normal(k1, (N, C), dtype=jnp.float32) * 3.0
    tgt1 = (jax.random.uniform(k2, (N, C)) > 0.5).astype(jnp.float32)
    loss1 = jax.block_until_ready(multiclass_bce_loss(out1, tgt1))
    ref1 = _reference(out1, tgt1)
    assert loss1.shape == (N, C)
    assert jnp.allclose(loss1, ref1, atol=1e-5, rtol=1e-5), (
        float(jnp.max(jnp.abs(loss1 - ref1))))

    # Plain BCE path (use_focal_weights=False) on the same inputs.
    loss1b = jax.block_until_ready(
        multiclass_bce_loss(out1, tgt1, use_focal_weights=False))
    ref1b = _reference(out1, tgt1, use_focal_weights=False)
    assert jnp.allclose(loss1b, ref1b, atol=1e-5, rtol=1e-5), (
        float(jnp.max(jnp.abs(loss1b - ref1b))))

    # Binary-target fast path (one fewer EUP exp; approx reciprocal -> looser tol).
    loss1c = jax.block_until_ready(
        multiclass_bce_loss(out1, tgt1, assume_binary_targets=True))
    assert jnp.allclose(loss1c, ref1, atol=5e-3, rtol=5e-3), (
        float(jnp.max(jnp.abs(loss1c - ref1))))

    # --- Test 2: (2, 4, 16, 32) -- total (4096) divisible by lane_width ->
    # zero-pad-free reshape path.
    shape2 = (2, 4, 16, 32)
    out2 = jax.random.normal(k3, shape2, dtype=jnp.float32) * 2.0
    tgt2 = (jax.random.uniform(k4, shape2) > 0.5).astype(jnp.float32)
    loss2 = jax.block_until_ready(multiclass_bce_loss(out2, tgt2))
    ref2 = _reference(out2, tgt2)
    assert loss2.shape == shape2
    assert jnp.allclose(loss2, ref2, atol=1e-5, rtol=1e-5), (
        float(jnp.max(jnp.abs(loss2 - ref2))))

    # --- Test 3: (64, 512) -- last dim multiple of 128 -> fully zero-copy
    # path, rows > 8 -> multi-step parallel grid (>= 2 blocks).
    shape3 = (64, 512)
    out3 = jax.random.normal(k5, shape3, dtype=jnp.float32) * 2.0
    tgt3 = (jax.random.uniform(k6, shape3) > 0.5).astype(jnp.float32)
    loss3 = jax.block_until_ready(multiclass_bce_loss(out3, tgt3))
    ref3 = _reference(out3, tgt3)
    assert loss3.shape == shape3
    assert jnp.allclose(loss3, ref3, atol=1e-5, rtol=1e-5), (
        float(jnp.max(jnp.abs(loss3 - ref3))))

    print("KERNEL_OK")
</pallas_src>

<mosaic_0001>
module attributes {stable_mosaic.version = 11 : i64} {
  func.func @_focal_bce_kernel(%arg0: i32, %arg1: memref<3x512xf32, #tpu.memory_space<vmem>>, %arg2: memref<3x512xf32, #tpu.memory_space<vmem>>, %arg3: memref<3x512xf32, #tpu.memory_space<vmem>>) attributes {dimension_semantics = [#tpu.dimension_semantics<parallel>], iteration_bounds = array<i64: 1>, scalar_prefetch = 0 : i64, scratch_operands = 0 : i64, tpu.core_type = #tpu.core_type<tc>, window_params = [{transform_indices = @transform_0, window_bounds = array<i64: 3, 512>}, {transform_indices = @transform_1, window_bounds = array<i64: 3, 512>}, {transform_indices = @transform_2, window_bounds = array<i64: 3, 512>}]} {
    %c0 = arith.constant 0 : index
    %c0_0 = arith.constant 0 : index
    %0 = vector.load %arg1[%c0, %c0_0] : memref<3x512xf32, #tpu.memory_space<vmem>>, vector<3x512xf32>
    %c0_1 = arith.constant 0 : index
    %c0_2 = arith.constant 0 : index
    %1 = vector.load %arg2[%c0_1, %c0_2] : memref<3x512xf32, #tpu.memory_space<vmem>>, vector<3x512xf32>
    %2 = math.absf %0 : vector<3x512xf32>
    %cst = arith.constant 0.000000e+00 : f32
    %3 = vector.broadcast %cst : f32 to vector<3x512xf32>
    %4 = arith.subf %3, %2 : vector<3x512xf32>
    %5 = math.exp %4 : vector<3x512xf32>
    %cst_3 = arith.constant 0.000000e+00 : f32
    %6 = vector.broadcast %cst_3 : f32 to vector<3x512xf32>
    %7 = arith.maximumf %0, %6 : vector<3x512xf32>
    %8 = arith.mulf %0, %1 : vector<3x512xf32>
    %9 = arith.subf %7, %8 : vector<3x512xf32>
    %10 = math.log1p %5 : vector<3x512xf32>
    %11 = arith.addf %9, %10 : vector<3x512xf32>
    %cst_4 = arith.constant 0.000000e+00 : f32
    %12 = vector.broadcast %cst_4 : f32 to vector<3x512xf32>
    %13 = arith.subf %12, %11 : vector<3x512xf32>
    %14 = math.exp %13 : vector<3x512xf32>
    %cst_5 = arith.constant 1.000000e+00 : f32
    %15 = vector.broadcast %cst_5 : f32 to vector<3x512xf32>
    %16 = arith.subf %15, %14 : vector<3x512xf32>
    %17 = arith.mulf %16, %16 : vector<3x512xf32>
    %18 = arith.mulf %17, %13 : vector<3x512xf32>
    %cst_6 = arith.constant 0.000000e+00 : f32
    %19 = vector.broadcast %cst_6 : f32 to vector<3x512xf32>
    %20 = arith.subf %19, %18 : vector<3x512xf32>
    %cst_7 = arith.constant 2.500000e-01 : f32
    %21 = vector.broadcast %cst_7 : f32 to vector<3x512xf32>
    %22 = arith.mulf %21, %20 : vector<3x512xf32>
    %c0_8 = arith.constant 0 : index
    %c0_9 = arith.constant 0 : index
    %23 = vector.load %arg3[%c0_8, %c0_9] : memref<3x512xf32, #tpu.memory_space<vmem>>, vector<3x512xf32>
    tpu.vector_store %arg3[%c0_8, %c0_9], %22 {strides = array<i32>} : memref<3x512xf32, #tpu.memory_space<vmem>>, vector<3x512xf32>,
    return
  }
  func.func @transform_0(%arg0: i32) -> (i32, i32) {
    %c0_i32 = arith.constant 0 : i32
    %c0_i32_0 = arith.constant 0 : i32
    return %arg0, %c0_i32 : i32, i32
  }
  func.func @transform_1(%arg0: i32) -> (i32, i32) {
    %c0_i32 = arith.constant 0 : i32
    %c0_i32_0 = arith.constant 0 : i32
    return %arg0, %c0_i32 : i32, i32
  }
  func.func @transform_2(%arg0: i32) -> (i32, i32) {
    %c0_i32 = arith.constant 0 : i32
    %c0_i32_0 = arith.constant 0 : i32
    return %arg0, %c0_i32 : i32, i32
  }
}

</mosaic_0001>

<bundles_post_ra>
// kernel: tpu_custom_call.1
= control target key start
LH: loop header
LB: loop body
LE: loop exit
PB: predicated region body
PF: predicated region fallthrough
CT: control target
= control target key end

     0   :  { %7 = vsyncpa [#allocation3], 0  ;;  %s249_s0 = inlined_call_operand.hbm [shape: f32[3,512], index: 0, kind: input, shape index: {}]   ;;  %s250_s1 = inlined_call_operand.hbm [shape: f32[3,512], index: 1, kind: input, shape index: {}]   ;;  %s251_s2 = inlined_call_operand.hbm [shape: f32[3,512], index: 2, kind: output, shape index: {}]  }
   0x1   :  { %8 = vsyncpa [#allocation6], 0 }
   0x2   :  { %9 = vsyncpa [#allocation4], 0  ;;  %s195_s9 = smov [#allocation2]   ;;  %s196_s11 = smov [#allocation5]  }
   0x3   :  { %s16_s10 = sshll.u32 %s195_s9, 4  ;;  %s26_s12 = sshll.u32 %s196_s11, 4  ;;  %s17_s10 = int_to_ptr.vmem [resolvable:$true] %s16_s10  ;;  %s27_s12 = int_to_ptr.vmem [resolvable:$true] %s26_s12 }
   0x4   :  { %s123_s15 = scalar_lea.hbm %s249_s0, 256 }
   0x5   :  { %p124_p0 = scmp.ne.s32.totalorder %s249_s0, %s123_s15  ;;  %p127_p1 = scmp.lt.u32.totalorder %s123_s15, %s249_s0 }
   0x7   :  { %p129_p2 = pnand %p127_p1, %p124_p0 }
   0x9   :  { %132 = shalt.err (!%p129_p2)
}
   0xa   :  { %s133_s20 = scalar_lea.vmem %s17_s10, 256  ;;  %p138_p4 = scmp.lt.s32.totalorder %s17_s10, %s17_s10 }
   0xb   :  { %p134_p3 = scmp.ne.s32.totalorder %s17_s10, %s133_s20  ;;  %p139_p5 = scmp.lt.s32.totalorder %s133_s20, %s133_s20 }
   0xd   :  { %p140_p6 = por %p139_p5, %p138_p4 }
   0xf   :  { %p141_p7 = pnand %p140_p6, %p134_p3 }
  0x11   :  { %144 = shalt.err (!%p141_p7)
}
  0x12   :  { %19 = dma.hbm_to_vmem [thread:$0]  %s249_s0, 256, %s17_s10, [#allocation3]  }
  0x13   :  { %s145_s25 = scalar_lea.hbm %s250_s1, 256 }
  0x14   :  { %p146_p8 = scmp.ne.s32.totalorder %s250_s1, %s145_s25  ;;  %p149_p9 = scmp.lt.u32.totalorder %s145_s25, %s250_s1 }
  0x16   :  { %p151_p10 = pnand %p149_p9, %p146_p8 }
  0x18   :  { %154 = shalt.err (!%p151_p10)
}
  0x19   :  { %s155_s30 = scalar_lea.vmem %s27_s12, 256  ;;  %p160_p12 = scmp.lt.s32.totalorder %s27_s12, %s27_s12 }
  0x1a   :  { %p156_p11 = scmp.ne.s32.totalorder %s27_s12, %s155_s30  ;;  %p161_p13 = scmp.lt.s32.totalorder %s155_s30, %s155_s30 }
  0x1c   :  { %p162_p0 = por %p161_p13, %p160_p12 }
  0x1e   :  { %p163_p1 = pnand %p162_p0, %p156_p11 }
  0x20   :  { %166 = shalt.err (!%p163_p1)
}
  0x21   :  { %29 = dma.hbm_to_vmem [thread:$0]  %s250_s1, 256, %s27_s12, [#allocation6]  }
  0x22   :  { %189 = dma.done.wait [#allocation3], 256  }
  0x23   :  { %190 = vsyncadd [#allocation3], 4294967040 }
  0x24   :  { %191 = dma.done.wait [#allocation6], 256  }
  0x25   :  { %192 = vsyncadd [#allocation6], 4294967040  ;;  %v36_v0 = vld [vmem:[#allocation2] sm:$0x77]  ;;  %v37_v1 = vld [vmem:[#allocation2 + $0x8] sm:$0x77] }
  0x26   :  { %v40_v2 = vand.u32 2147483647, %v36_v0  ;;  %v41_v3 = vand.u32 2147483647, %v37_v1  ;;  %v38_v14 = vld [vmem:[#allocation5] sm:$0x77] }
  0x27   :  { %v39_v15 = vld [vmem:[#allocation5 + $0x8] sm:$0x77]  ;;  %v48_v17 = vmax.f32 %v36_v0, 0.0  ;;  %v50_v18 = vmul.f32 %v38_v14, %v36_v0  ;;  %v49_v21 = vmax.f32 %v37_v1, 0.0  ;;  %s197_s1 = smov [#allocation7]  }
  0x28   :  { %v42_v4 = vsub.f32 0.0, %v40_v2  ;;  %v43_v5 = vsub.f32 0.0, %v41_v3  ;;  %v51_v22 = vmul.f32 %v39_v15, %v37_v1  ;;  %s98_s4 = sshll.u32 %s197_s1, 4  ;;  %s99_s4 = int_to_ptr.vmem [resolvable:$true] %s98_s4 }
  0x29   :  { %v52_v26 = vsub.f32 %v48_v17, %v50_v18  ;;  %s167_s5 = scalar_lea.vmem %s99_s4, 256  ;;  %p172_p3 = scmp.lt.s32.totalorder %s99_s4, %s99_s4 }
  0x2a   :  { %v44_v6 = vmul.f32 1.442695, %v42_v4  ;;  %v46_v7 = vmul.f32 1.442695, %v43_v5  ;;  %v53_v30 = vsub.f32 %v49_v21, %v51_v22  ;;  %p168_p2 = scmp.ne.s32.totalorder %s99_s4, %s167_s5  ;;  %p173_p4 = scmp.lt.s32.totalorder %s167_s5, %s167_s5 }
  0x2c   :  { %111 = vpow2.f32 %v44_v6  ;;  %p174_p5 = por %p173_p4, %p172_p3 }
  0x2d   :  { %113 = vpow2.f32 %v46_v7 }
  0x2e   :  { %p175_p6 = pnand %p174_p5, %p168_p2 }
  0x36   :  { %v112_v8 = vpop.eup %111 }
  0x37   :  { %v114_v9 = vpop.eup %113  ;;  %v54_v10 = vadd.f32 1.0, %v112_v8  ;;  %v57_v12 = vmul.f32 -0.5, %v112_v8  ;;  %v60_v19 = vand.u32 2147483647, %v112_v8 }
  0x38   :  { %v63_v11 = vadd.f32 1.0, %v114_v9  ;;  %v66_v13 = vmul.f32 -0.5, %v114_v9  ;;  %v69_v23 = vand.u32 2147483647, %v114_v9 }
  0x39   :  { %115 = vlog2.f32 %v54_v10  ;;  %v58_v16 = vadd.f32 1.0, %v57_v12  ;;  %vm61_vm0 = vcmp.lt.f32.partialorder %v60_v19, 0.0004427343 }
  0x3a   :  { %117 = vlog2.f32 %v63_v11  ;;  %v67_v20 = vadd.f32 1.0, %v66_v13  ;;  %vm70_vm1 = vcmp.lt.f32.partialorder %v69_v23, 0.0004427343 }
  0x3b   :  { %v59_v24 = vmul.f32 %v112_v8, %v58_v16 }
  0x3c   :  { %v68_v27 = vmul.f32 %v114_v9, %v67_v20 }
  0x43   :  { %v116_v25 = vpop.eup %115 }
  0x44   :  { %v118_v28 = vpop.eup %117  ;;  %v56_v29 = vmul.f32 0.6931472, %v116_v25 }
  0x45   :  { %v65_v31 = vmul.f32 0.6931472, %v118_v28 }
  0x46   :  { %v62_v32 = vsel %vm61_vm0, %v59_v24, %v56_v29 }
  0x47   :  { %v72_v33 = vadd.f32 %v62_v32, %v52_v26  ;;  %v71_v34 = vsel %vm70_vm1, %v68_v27, %v65_v31 }
  0x48   :  { %v73_v35 = vadd.f32 %v71_v34, %v53_v30 }
  0x49   :  { %v74_v36 = vsub.f32 0.0, %v72_v33 }
  0x4a   :  { %v75_v37 = vsub.f32 0.0, %v73_v35 }
  0x4b   :  { %v76_v38 = vmul.f32 1.442695, %v74_v36 }
  0x4c   :  { %v78_v39 = vmul.f32 1.442695, %v75_v37 }
  0x4d   :  { %119 = vpow2.f32 %v76_v38 }
  0x4e   :  { %121 = vpow2.f32 %v78_v39 }
  0x57   :  { %v120_v40 = vpop.eup %119 }
  0x58   :  { %v122_v41 = vpop.eup %121  ;;  %v80_v42 = vsub.f32 1.0, %v120_v40 }
  0x59   :  { %v81_v43 = vsub.f32 1.0, %v122_v41 }
  0x5a   :  { %v82_v44 = vmul.f32 %v80_v42, %v80_v42 }
  0x5b   :  { %v83_v45 = vmul.f32 %v81_v43, %v81_v43 }
  0x5c   :  { %v84_v46 = vmul.f32 %v82_v44, %v74_v36 }
  0x5d   :  { %v85_v47 = vmul.f32 %v83_v45, %v75_v37 }
  0x5e   :  { %v86_v48 = vsub.f32 0.0, %v84_v46 }
  0x5f   :  { %v87_v49 = vsub.f32 0.0, %v85_v47 }
  0x60   :  { %v88_v50 = vmul.f32 0.25, %v86_v48 }
  0x61   :  { %v89_v51 = vmul.f32 0.25, %v87_v49 }
  0x62   :  { %90 = vst [vmem:[#allocation7] sm:$0x77] %v88_v50 }
  0x63   :  { %91 = vst [vmem:[#allocation7 + $0x8] sm:$0x77] %v89_v51 }
  0x64   :  { %178 = shalt.err (!%p175_p6)
}
  0x65   :  { %s179_s8 = scalar_lea.hbm %s251_s2, 256 }
  0x66   :  { %p180_p7 = scmp.ne.s32.totalorder %s251_s2, %s179_s8  ;;  %p183_p8 = scmp.lt.u32.totalorder %s179_s8, %s251_s2 }
  0x68   :  { %p185_p9 = pnand %p183_p8, %p180_p7 }
  0x6a   :  { %188 = shalt.err (!%p185_p9)
}
  0x6b   :  { %101 = dma.vmem_to_hbm [thread:$0]  %s99_s4, 256, %s251_s2, [#allocation4]  }
  0x6c   :  { %193 = dma.done.wait [#allocation4], 256  }
  0x6d   :  { %194 = vsyncadd [#allocation4], 4294967040 }
  0x6e   :  { %105 = vsyncpa [#allocation3], 1 }
  0x6f   :  { %106 = vsyncpa [#allocation6], 1 }
  0x70   :  { %107 = vsyncpa [#allocation4], 1 }

</bundles_post_ra>
